<compile_context>
chip_gen: v6e
topology: v6e:2x2x1
jax: 0.10.0
libtpu: 0.0.40
codegen_flags: <defaults>
</compile_context>

<pallas_src>
import jax
import jax.numpy as jnp
from jax.experimental import pallas as pl
from jax.experimental.pallas import tpu as pltpu

_MIB = 1 << 20


def _vmem_capacity_bytes():
    try:
        return int(pltpu.get_tpu_info().vmem_capacity_bytes)
    except Exception:
        return 64 * _MIB  # conservative (v7x-sized) fallback


def _pick_batch_block(batch, vmem_per_batch, budget):
    """Largest bb under the VMEM budget, but keep >=2 (ideally >=4) grid steps."""
    bb = max(1, min(batch, budget // max(vmem_per_batch, 1)))
    min_steps = min(batch, 4)   # shard batch across v7x cores + keep DMAs pipelined
    if min_steps > 1:
        bb = min(bb, max(1, batch // min_steps))
    return bb


def _make_kernel(hw):
    inv_hw = 1.0 / float(hw)

    def kernel(x_ref, w1t_ref, w2t_ref, o_ref):
        # x_ref:   [bb, C, HW]  (input dtype)
        # w1t_ref: [C, hidden]  f32   (conv1 weight, transposed)
        # w2t_ref: [hidden, C]  f32   (conv2 weight, transposed)
        x = x_ref[...]

        # Global pooling over the spatial (lane) axis, vectorized across the
        # whole batch block.  Sum accumulates in f32; max is exact in the
        # input dtype and only the tiny [bb, C] result is upcast.  Mosaic
        # masks the physical lane padding for logically-ragged HW.
        avg = jnp.sum(x, axis=-1, dtype=jnp.float32) * inv_hw           # [bb, C]
        mx = jnp.max(x, axis=-1).astype(jnp.float32)                    # [bb, C]

        w1t = w1t_ref[...]
        w2t = w2t_ref[...]

        # Shared MLP.  Second 1x1 conv is linear, so
        #   mlp(avg) + mlp(max) = (relu(avg@W1t) + relu(max@W1t)) @ W2t
        # -> 3 batched matmuls per block instead of 3 degenerate N=1 dots
        #    per image.
        h = (jnp.maximum(jnp.dot(avg, w1t, preferred_element_type=jnp.float32), 0.0)
             + jnp.maximum(jnp.dot(mx, w1t, preferred_element_type=jnp.float32), 0.0))
        y = jnp.dot(h, w2t, preferred_element_type=jnp.float32)         # [bb, C]
        scale = jax.nn.sigmoid(y)                                       # [bb, C] f32

        # One broadcast multiply over the whole block, in the input dtype so
        # the store path never widens to f32.
        o_ref[...] = (x * scale[:, :, None].astype(x.dtype)).astype(o_ref.dtype)

    return kernel


def _channel_attention(x, w1, w2):
    """x: [B, C, H, W]; w1: [hidden, C] (conv1 weight); w2: [C, hidden] (conv2 weight)."""
    B, C, H, W = x.shape
    hidden = w1.shape[0]
    hw = H * W

    # [B, C, H, W] -> [B, C, H*W]: contiguous collapse, no HBM copy.
    x_flat = x.reshape(B, C, hw)

    itemsize = jnp.dtype(x.dtype).itemsize
    hbm_per_batch = C * hw * itemsize
    # Pooling math runs in f32 on every generation (v5e has no bf16 VALU/EUP),
    # so account for a transient f32 working set when activations are <32-bit.
    f32_ws_per_batch = C * hw * 4 if itemsize < 4 else 0
    # Double-buffered input + output blocks, plus the f32 working set.
    vmem_per_batch = 4 * hbm_per_batch + f32_ws_per_batch

    vmem_cap = _vmem_capacity_bytes()
    # Generation-aware budget: v7x has 64 MiB physical VMEM, v5e/v6e 128 MiB.
    block_vmem_budget = 24 * _MIB if vmem_cap > 64 * _MIB else 14 * _MIB

    bb = _pick_batch_block(B, vmem_per_batch, block_vmem_budget)
    grid = (pl.cdiv(B, bb),)   # ragged last block OK: per-row work is independent

    weight_bytes = 2 * C * hidden * 4
    needed_vmem = bb * vmem_per_batch + 2 * weight_bytes + 2 * _MIB
    # Raise the scoped-VMEM limit past v5e's 16 MiB default when needed, but
    # never past ~3/4 of physical VMEM (v7x headroom).
    vmem_limit = int(min(vmem_cap * 3 // 4, max(32 * _MIB, needed_vmem)))

    # Hoist the f32 upcast + transpose of the tiny weights out of the kernel.
    w1t = w1.astype(jnp.float32).T     # [C, hidden]
    w2t = w2.astype(jnp.float32).T     # [hidden, C]

    cost = pl.CostEstimate(
        flops=2 * B * C * hw + 6 * B * C * hidden,
        transcendentals=B * C,
        bytes_accessed=2 * B * C * hw * itemsize + 2 * C * hidden * 4,
    )

    out_flat = pl.pallas_call(
        _make_kernel(hw),
        out_shape=jax.ShapeDtypeStruct((B, C, hw), x.dtype),
        grid_spec=pltpu.PrefetchScalarGridSpec(
            num_scalar_prefetch=0,
            grid=grid,
            in_specs=[
                pl.BlockSpec((bb, C, hw), lambda b: (b, 0, 0)),
                pl.BlockSpec((C, hidden), lambda b: (0, 0)),   # VMEM-resident weights
                pl.BlockSpec((hidden, C), lambda b: (0, 0)),   # VMEM-resident weights
            ],
            out_specs=pl.BlockSpec((bb, C, hw), lambda b: (b, 0, 0)),
        ),
        compiler_params=pltpu.CompilerParams(
            dimension_semantics=("parallel",),
            vmem_limit_bytes=vmem_limit,
        ),
        cost_estimate=cost,
    )(x_flat, w1t, w2t)

    return out_flat.reshape(B, C, H, W)


channel_attention = jax.jit(_channel_attention)


def reference(x, w1, w2):
    xf = x.astype(jnp.float32)
    avg = jnp.mean(xf, axis=(2, 3))                               # [B, C]
    mx = jnp.max(xf, axis=(2, 3))                                 # [B, C]

    def mlp(v):                                                   # v: [B, C]
        h = jnp.maximum(jnp.einsum("hc,bc->bh", w1.astype(jnp.float32), v), 0.0)
        return jnp.einsum("ch,bh->bc", w2.astype(jnp.float32), h)

    scale = jax.nn.sigmoid(mlp(avg) + mlp(mx))                    # [B, C]
    return xf * scale[:, :, None, None]


if __name__ == "__main__":
    key = jax.random.PRNGKey(0)
    kx, k1, k2, kx2 = jax.random.split(key, 4)

    # Shapes consistent with ChannelAttention(in_planes=32, ratio=16) -> hidden=2.
    B, C, H, W = 2, 32, 16, 16
    ratio = 16
    hidden = int(C / ratio)

    x = jax.random.normal(kx, (B, C, H, W), dtype=jnp.float32)
    # Conv2d(C, hidden, 1, bias=False).weight -> (hidden, C);
    # Conv2d(hidden, C, 1, bias=False).weight -> (C, hidden).
    w1 = jax.random.normal(k1, (hidden, C), dtype=jnp.float32) * 0.1
    w2 = jax.random.normal(k2, (C, hidden), dtype=jnp.float32) * 0.1

    out = jax.block_until_ready(channel_attention(x, w1, w2))
    ref = reference(x, w1, w2)
    assert out.shape == (B, C, H, W)
    assert jnp.allclose(out, ref, atol=1e-5, rtol=1e-5), "mismatch (128-aligned HW)"

    # Ragged spatial size (HW = 81, not a multiple of 128): exercises the
    # full-extent last-dim BlockSpec / masked tail-store path (no padding).
    x2 = jax.random.normal(kx2, (B, C, 9, 9), dtype=jnp.float32)
    out2 = jax.block_until_ready(channel_attention(x2, w1, w2))
    ref2 = reference(x2, w1, w2)
    assert out2.shape == (B, C, 9, 9)
    assert jnp.allclose(out2, ref2, atol=1e-5, rtol=1e-5), "mismatch (ragged HW)"

    print("KERNEL_OK")
</pallas_src>

<mosaic_0001>
module attributes {stable_mosaic.version = 11 : i64} {
  func.func @kernel(%arg0: i32, %arg1: memref<1x32x256xf32, #tpu.memory_space<vmem>>, %arg2: memref<32x2xf32, #tpu.memory_space<vmem>>, %arg3: memref<2x32xf32, #tpu.memory_space<vmem>>, %arg4: memref<1x32x256xf32, #tpu.memory_space<vmem>>) attributes {dimension_semantics = [#tpu.dimension_semantics<parallel>], iteration_bounds = array<i64: 2>, scalar_prefetch = 0 : i64, scratch_operands = 0 : i64, tpu.core_type = #tpu.core_type<tc>, window_params = [{transform_indices = @transform_0, window_bounds = array<i64: 1, 32, 256>}, {pipeline_mode = #tpu.pipeline_mode<synchronous>, transform_indices = @transform_1, window_bounds = array<i64: 32, 2>}, {pipeline_mode = #tpu.pipeline_mode<synchronous>, transform_indices = @transform_2, window_bounds = array<i64: 2, 32>}, {transform_indices = @transform_3, window_bounds = array<i64: 1, 32, 256>}]} {
    %c0 = arith.constant 0 : index
    %c0_0 = arith.constant 0 : index
    %c0_1 = arith.constant 0 : index
    %0 = vector.load %arg1[%c0, %c0_0, %c0_1] : memref<1x32x256xf32, #tpu.memory_space<vmem>>, vector<1x32x256xf32>
    %cst = arith.constant dense<0.000000e+00> : vector<1x32xf32>
    %1 = vector.multi_reduction <add>, %0, %cst [2] : vector<1x32x256xf32> to vector<1x32xf32>
    %cst_2 = arith.constant 3.906250e-03 : f32
    %2 = vector.broadcast %cst_2 : f32 to vector<1x32xf32>
    %3 = arith.mulf %1, %2 : vector<1x32xf32>
    %cst_3 = arith.constant dense<0xFF800000> : vector<1x32xf32>
    %4 = vector.multi_reduction <maximumf>, %0, %cst_3 [2] : vector<1x32x256xf32> to vector<1x32xf32>
    %c0_4 = arith.constant 0 : index
    %c0_5 = arith.constant 0 : index
    %5 = vector.load %arg2[%c0_4, %c0_5] : memref<32x2xf32, #tpu.memory_space<vmem>>, vector<32x2xf32>
    %c0_6 = arith.constant 0 : index
    %c0_7 = arith.constant 0 : index
    %6 = vector.load %arg3[%c0_6, %c0_7] : memref<2x32xf32, #tpu.memory_space<vmem>>, vector<2x32xf32>
    %cst_8 = arith.constant dense<0.000000e+00> : vector<1x2xf32>
    %7 = tpu.matmul %3, %5, %cst_8 {dimension_numbers = #tpu.dot_dimension_numbers<[1], [0], [0], [1], [0, 0, 1, 1], [], []>} : vector<1x32xf32>, vector<32x2xf32>, vector<1x2xf32> -> vector<1x2xf32>
    %cst_9 = arith.constant 0.000000e+00 : f32
    %8 = vector.broadcast %cst_9 : f32 to vector<1x2xf32>
    %9 = arith.maximumf %7, %8 : vector<1x2xf32>
    %cst_10 = arith.constant dense<0.000000e+00> : vector<1x2xf32>
    %10 = tpu.matmul %4, %5, %cst_10 {dimension_numbers = #tpu.dot_dimension_numbers<[1], [0], [0], [1], [0, 0, 1, 1], [], []>} : vector<1x32xf32>, vector<32x2xf32>, vector<1x2xf32> -> vector<1x2xf32>
    %cst_11 = arith.constant 0.000000e+00 : f32
    %11 = vector.broadcast %cst_11 : f32 to vector<1x2xf32>
    %12 = arith.maximumf %10, %11 : vector<1x2xf32>
    %13 = arith.addf %9, %12 : vector<1x2xf32>
    %cst_12 = arith.constant dense<0.000000e+00> : vector<1x32xf32>
    %14 = tpu.matmul %13, %6, %cst_12 {dimension_numbers = #tpu.dot_dimension_numbers<[1], [0], [0], [1], [0, 0, 1, 1], [], []>} : vector<1x2xf32>, vector<2x32xf32>, vector<1x32xf32> -> vector<1x32xf32>
    %15 = arith.negf %14 : vector<1x32xf32>
    %16 = math.exp %15 : vector<1x32xf32>
    %cst_13 = arith.constant 1.000000e+00 : f32
    %17 = vector.broadcast %cst_13 : f32 to vector<1x32xf32>
    %18 = arith.addf %17, %16 : vector<1x32xf32>
    %19 = arith.divf %17, %18 : vector<1x32xf32>
    %20 = vector.shape_cast %19 : vector<1x32xf32> to vector<1x32x1xf32>
    %21 = vector.broadcast %20 : vector<1x32x1xf32> to vector<1x32x256xf32>
    %22 = arith.mulf %0, %21 : vector<1x32x256xf32>
    %c0_14 = arith.constant 0 : index
    %c0_15 = arith.constant 0 : index
    %c0_16 = arith.constant 0 : index
    %23 = vector.load %arg4[%c0_14, %c0_15, %c0_16] : memref<1x32x256xf32, #tpu.memory_space<vmem>>, vector<1x32x256xf32>
    tpu.vector_store %arg4[%c0_14, %c0_15, %c0_16], %22 {strides = array<i32>} : memref<1x32x256xf32, #tpu.memory_space<vmem>>, vector<1x32x256xf32>,
    return
  }
  func.func @transform_0(%arg0: i32) -> (i32, i32, i32) {
    %c0_i32 = arith.constant 0 : i32
    %c0_i32_0 = arith.constant 0 : i32
    %c0_i32_1 = arith.constant 0 : i32
    return %arg0, %c0_i32, %c0_i32_0 : i32, i32, i32
  }
  func.func @transform_1(%arg0: i32) -> (i32, i32) {
    %c0_i32 = arith.constant 0 : i32
    %c0_i32_0 = arith.constant 0 : i32
    %c0_i32_1 = arith.constant 0 : i32
    return %c0_i32, %c0_i32_0 : i32, i32
  }
  func.func @transform_2(%arg0: i32) -> (i32, i32) {
    %c0_i32 = arith.constant 0 : i32
    %c0_i32_0 = arith.constant 0 : i32
    %c0_i32_1 = arith.constant 0 : i32
    return %c0_i32, %c0_i32_0 : i32, i32
  }
  func.func @transform_3(%arg0: i32) -> (i32, i32, i32) {
    %c0_i32 = arith.constant 0 : i32
    %c0_i32_0 = arith.constant 0 : i32
    %c0_i32_1 = arith.constant 0 : i32
    return %arg0, %c0_i32, %c0_i32_0 : i32, i32, i32
  }
}

</mosaic_0001>

<bundles_post_ra>
// kernel: _channel_attention.1
= control target key start
LH: loop header
LB: loop body
LE: loop exit
PB: predicated region body
PF: predicated region fallthrough
CT: control target
= control target key end

     0   :  { %s689_s12 = smov 0   ;;  %s794_s0 = inlined_call_operand.vmem [shape: f32[2,32,256], index: 0, kind: input, shape index: {}]   ;;  %s795_s1 = inlined_call_operand.vmem [shape: f32[32,2], index: 1, kind: input, shape index: {}]   ;;  %s796_s2 = inlined_call_operand.vmem [shape: f32[2,32], index: 2, kind: input, shape index: {}]   ;;  %s797_s3 = inlined_call_operand.vmem [shape: f32[2,32,256], index: 3, kind: output, shape index: {}]  }
   0x1 LB: > { %s588_s13 = sadd.s32 4294967295, %s665_s12   ;;  %p592_p0 = scmp.ge.s32.totalorder %s665_s12, 1  ;;  %s665_s12 = sphi %s689_s12, %s13_s12  }
   0x2   : > { %p137_p1 = scmp.lt.s32.totalorder %s665_s12, 3 }
   0x4   : > { %p138_p2 = pnand %p592_p0, %p137_p1 }
   0x5   : > { %p161_p3 = scmp.lt.s32.totalorder (!%p138_p2), %s588_s13, 1 }
   0x6   : > { %141 = sbr.rel (%p138_p2) target bundleno = 722 (0x2d2), region = 32 }
   0xb   : > { %s799_s13 = smov (!%p161_p3, %s588_s13), 1  ;;  %v667_v16 = vmov 0.0   ;;  %v210_v17 = vld [vmem:[%s795_s1 + $0x18] sm:$0xff]  ;;  %v209_v18 = vld [vmem:[%s795_s1 + $0x10] sm:$0xff]  ;;  %v208_v19 = vld [vmem:[%s795_s1 + $0x8] sm:$0xff]  ;;  %vm668_vm0 = vmmov 0   ;;  %v216_v21 = vlaneseq }
   0xc   : > { %s604_s14 = sshll.u32 %s799_s13, 6  ;;  %618 = vmatprep.subr.mxu0 %v667_v16  ;;  %629 = vmatprep.subr.mxu1 %v667_v16  ;;  %v207_v20 = vld [vmem:[%s795_s1] sm:$0xff]  ;;  %vm227_vm1 = vcmask 130112   ;;  %vm234_vm2 = vcmask 195712   ;;  %vm241_vm3 = vcmask 261312   ;;  %vm243_vm4 = vcmask 261120  }
   0xd   : > { %s165_s17 = scalar_lea.vmem %s794_s0, %s604_s14  ;;  %619 = vmatpush3.msra.mxu0 %v210_v17  ;;  %630 = vmatpush3.msra.mxu1 %v210_v17  ;;  %v217_v22 = vand.u32 127, %v216_v21  ;;  %v762_v23 = vshrl.u32 %v216_v21, 7  ;;  %v211_v57 = vld [vmem:[%s796_s2] sm:$0x3]  ;;  %vm418_vm5 = vcmask 1041408   ;;  %vm414_vm6 = vcmask 15360   ;;  %s170_s30 = scalar_lea.vmem %s797_s3, %s604_s14 }
   0xe   : > { %v705_v0 = vld [vmem:[%s165_s17 + $0x20] sm:$0xff]  ;;  %v707_v1 = vld [vmem:[%s165_s17 + $0x28] sm:$0xff]  ;;  %v715_v5 = vld [vmem:[%s165_s17 + $0x30] sm:$0xff]  ;;  %620 = vmatprep.subr.mxu0 %v667_v16  ;;  %631 = vmatprep.subr.mxu1 %v667_v16 }
   0xf   : > { %v709_v2 = vld [vmem:[%s165_s17] sm:$0xff]  ;;  %v185_v3 = vadd.f32 %v707_v1, %v705_v0  ;;  %v713_v4 = vld [vmem:[%s165_s17 + $0x8] sm:$0xff]  ;;  %v717_v6 = vld [vmem:[%s165_s17 + $0x38] sm:$0xff]  ;;  %v201_v15 = vmax.f32 %v705_v0, %v707_v1  ;;  %621 = vmatpush3.msra.mxu0 %v209_v18  ;;  %632 = vmatpush3.msra.mxu1 %v209_v18  ;;  %v236_v25 = vadd.s32 4294967272, %v217_v22  ;;  %v222_v26 = vadd.s32 4294967288, %v217_v22 }
  0x10   : > { %v179_v7 = vadd.f32 %v713_v4, %v709_v2  ;;  %v721_v8 = vld [vmem:[%s165_s17 + $0x10] sm:$0xff]  ;;  %v723_v9 = vld [vmem:[%s165_s17 + $0x18] sm:$0xff]  ;;  %v188_v10 = vadd.f32 %v717_v6, %v715_v5  ;;  %v195_v13 = vmax.f32 %v709_v2, %v713_v4  ;;  %v204_v14 = vmax.f32 %v715_v5, %v717_v6  ;;  %622 = vmatprep.subr.mxu0 %v667_v16 }
  0x11   : > { %186 = vadd.xlane.f32.xlu1 %v185_v3  ;;  %v182_v11 = vadd.f32 %v723_v9, %v721_v8  ;;  %v198_v12 = vmax.f32 %v721_v8, %v723_v9  ;;  %633 = vmatprep.subr.mxu1 %v667_v16  ;;  %v229_v27 = vadd.s32 4294967280, %v217_v22  ;;  %v220_v29 = vsub.s32 %v217_v22, %v762_v23 }
  0x12   : > { %180 = vadd.xlane.f32.xlu0 %v179_v7  ;;  %623 = vmatpush3.msra.mxu0 %v208_v19  ;;  %v239_v31 = vsub.s32 %v236_v25, %v762_v23  ;;  %v225_v33 = vsub.s32 %v222_v26, %v762_v23 }
  0x13   : > { %634 = vmatpush3.msra.mxu1 %v208_v19  ;;  %624 = vmatprep.subr.mxu0 %v667_v16  ;;  %v232_v34 = vsub.s32 %v229_v27, %v762_v23 }
  0x14   : > { %635 = vmatprep.subr.mxu1 %v667_v16  ;;  %625 = vmatpush3.msra.mxu0 %v207_v20 }
  0x15   : > { %189 = vadd.xlane.f32.xlu1 %v188_v10  ;;  %626 = vmatprep.mubr.msk.f32.mxu0 %vm668_vm0, %v667_v16 }
  0x16   : > { %183 = vadd.xlane.f32.xlu0 %v182_v11  ;;  %636 = vmatpush3.msra.mxu1 %v207_v20 }
  0x17   : > { %637 = vmatprep.mubr.msk.f32.mxu1 %vm668_vm0, %v667_v16  ;;  %640 = vmatprep.subr.mxu0 %v667_v16 }
  0x19   : > { %199 = vmax.xlane.f32.xlu1 %v198_v12 }
  0x1a   : > { %196 = vmax.xlane.f32.xlu0 %v195_v13 }
  0x1d   : > { %205 = vmax.xlane.f32.xlu1 %v204_v14  ;;  %v500_v14 = vsub.s32 0, %v762_v23 }
  0x1e   : > { %202 = vmax.xlane.f32.xlu0 %v201_v15 }
  0x9a   : > { %v187_v24 = vpop.xlane.xlu1 %186 }
  0x9b   : > { %v181_v28 = vpop.xlane.xlu0 %180  ;;  %v193_v35 = vmul.f32 0.00390625, %v187_v24 }
  0x9c   : > { %v191_v30 = vmul.f32 0.00390625, %v181_v28 }
  0x9d   : > { %v233_v43 = vrot.slane %v193_v35, %v232_v34 }
  0x9e   : > { %v190_v32 = vpop.xlane.xlu1 %189  ;;  %v221_v39 = vrot.slane %v191_v30, %v220_v29 }
  0x9f   : > { %v194_v36 = vmul.f32 0.00390625, %v190_v32  ;;  %v184_v37 = vpop.xlane.xlu0 %183 }
  0xa0   : > { %v192_v38 = vmul.f32 0.00390625, %v184_v37 }
  0xa1   : > { %v240_v40 = vrot.slane %v194_v36, %v239_v31 }
  0xa2   : > { %v226_v41 = vrot.slane %v192_v38, %v225_v33  ;;  %v200_v42 = vpop.xlane.xlu1 %199 }
  0xa3   : > { %v197_v44 = vpop.xlane.xlu0 %196  ;;  %v328_v46 = vrot.slane %v200_v42, %v225_v33 }
  0xa4   : > { %v228_v45 = vsel %vm227_vm1, %v226_v41, %v221_v39  ;;  %v324_v47 = vrot.slane %v197_v44, %v220_v29 }
  0xa5   : > { %v235_v48 = vsel %vm234_vm2, %v233_v43, %v228_v45 }
  0xa6   : > { %v242_v49 = vsel %vm241_vm3, %v240_v40, %v235_v48  ;;  %v206_v50 = vpop.xlane.xlu1 %205  ;;  %v329_v54 = vsel %vm227_vm1, %v328_v46, %v324_v47 }
  0xa7   : > { %627 = vmatmul.mubr.msk.f32.vlgmr.msra.gmra.mxu0 %vm243_vm4, %v242_v49  ;;  %v203_v51 = vpop.xlane.xlu0 %202  ;;  %v338_v52 = vrot.slane %v206_v50, %v239_v31 }
  0xa8   : > { %v333_v53 = vrot.slane %v203_v51, %v232_v34  ;;  %642 = vmatprep.mubr.msk.f32.mxu0 %vm668_vm0, %v667_v16  ;;  %641 = vmatpush3.msk.msra.mxu0 %vm418_vm5, %v211_v57 }
  0xaa   : > { %v334_v55 = vsel %vm234_vm2, %v333_v53, %v329_v54 }
  0xab   : > { %v339_v56 = vsel %vm241_vm3, %v338_v52, %v334_v55 }
  0xac   : > { %638 = vmatmul.mubr.msk.f32.vlgmr.msra.gmra.mxu1 %vm243_vm4, %v339_v56 }
 0x167   : > { %v312_v58 = vpop.f32.mrf.mxu0 }
 0x168   : > { %v316_v61 = vmax.f32 %v312_v58, 0.0 }
 0x169   : > { %v628_v59 = vpop.f32.mrf.mxu0 }
 0x16c   : > { %v408_v60 = vpop.f32.mrf.mxu1 }
 0x16d   : > { %v412_v62 = vmax.f32 %v408_v60, 0.0 }
 0x16e   : > { %v639_v63 = vpop.f32.mrf.mxu1 }
 0x16f   : > { %v413_v3 = vadd.f32 %v412_v62, %v316_v61 }
 0x171   : > { %643 = vmatmul.mubr.msk.f32.vlgmr.msra.gmra.mxu0 %vm414_vm6, %v413_v3 }
 0x231   : > { %v488_v7 = vpop.f32.mrf.mxu0 }
 0x232   : > { %v601_v10 = vmul.f32 -1.442695, %v488_v7 }
 0x233   : > { %v644_v11 = vpop.f32.mrf.mxu0 }
 0x234   : > { %655 = vpow2.f32 %v601_v10 }
 0x241   : > { %v656_v12 = vpop.eup %655 }
 0x242   : > { %v495_v13 = vadd.f32 1.0, %v656_v12 }
 0x244   : > { %657 = vrcp.f32 %v495_v13 }
 0x251   : > { %v658_v15 = vpop.eup %657 }
 0x252   : > { %v501_v16 = vrot.slane %v658_v15, %v500_v14 }
 0x254   : > { %507 = vbcast.lane.b32.xlu1 %v501_v16, 264  ;;  %503 = vbcast.lane.b32.xlu0 %v501_v16, 256 }
 0x258   : > { %511 = vbcast.lane.b32.xlu1 %v501_v16, 272 }
 0x25c   : > { %515 = vbcast.lane.b32.xlu1 %v501_v16, 280 }
 0x2c6   : > { %v508_v17 = vpop.permute.xlu1 %507  ;;  %v504_v18 = vpop.permute.xlu0 %503 }
 0x2c7   : > { %v519_v19 = vmul.f32 %v508_v17, %v721_v8  ;;  %v520_v20 = vmul.f32 %v508_v17, %v723_v9  ;;  %v517_v21 = vmul.f32 %v504_v18, %v709_v2  ;;  %v518_v22 = vmul.f32 %v504_v18, %v713_v4 }
 0x2c9   : > { %527 = vst [vmem:[%s170_s30 + $0x10] sm:$0xff] %v519_v19  ;;  %528 = vst [vmem:[%s170_s30 + $0x18] sm:$0xff] %v520_v20 }
 0x2ca   : > { %525 = vst [vmem:[%s170_s30] sm:$0xff] %v517_v21  ;;  %526 = vst [vmem:[%s170_s30 + $0x8] sm:$0xff] %v518_v22  ;;  %v512_v23 = vpop.permute.xlu1 %511 }
 0x2cb   : > { %v521_v24 = vmul.f32 %v512_v23, %v705_v0  ;;  %v522_v25 = vmul.f32 %v512_v23, %v707_v1 }
 0x2cd   : > { %529 = vst [vmem:[%s170_s30 + $0x20] sm:$0xff] %v521_v24  ;;  %530 = vst [vmem:[%s170_s30 + $0x28] sm:$0xff] %v522_v25 }
 0x2ce   : > { %v516_v26 = vpop.permute.xlu1 %515 }
 0x2cf   : > { %v523_v8 = vmul.f32 %v516_v26, %v715_v5  ;;  %v524_v9 = vmul.f32 %v516_v26, %v717_v6 }
 0x2d1   : > { %531 = vst [vmem:[%s170_s30 + $0x30] sm:$0xff] %v523_v8  ;;  %532 = vst [vmem:[%s170_s30 + $0x38] sm:$0xff] %v524_v9 }
 0x2d2 PF: > { %s13_s12 = sadd.s32 1, %s665_s12  }
 0x2d3   : > { %p10_p4 = scmp.ge.s32.totalorder %s13_s12, 4  }
 0x2d5   :  { %12 = sbr.rel (!%p10_p4) target bundleno = 1 (0x1), region = 62 }

</bundles_post_ra>
